<compile_context>
chip_gen: v7x
topology: tpu7x:2x2x1
jax: 0.10.0
libtpu: 0.0.40
codegen_flags: <defaults>
</compile_context>

<pallas_src>
import functools

import jax
import jax.numpy as jnp
from jax.experimental import pallas as pl
from jax.experimental.pallas import tpu as pltpu


def _rmsnorm_kernel(x_ref, w_ref, o_ref, *, eps):
    # x_ref: (tile_rows, dim)   w_ref: (1, dim) f32 (resident)   o_ref: (tile_rows, dim)
    # First pass: sum of squares in f32 (do NOT keep the upcast live past the
    # reduction barrier).
    xs = x_ref[...].astype(jnp.float32)
    ms = jnp.mean(xs * xs, axis=-1, keepdims=True)
    inv = jax.lax.rsqrt(ms + eps)
    # Second pass: re-read x_ref so the f32 tile above is dead by now; this
    # keeps live VMEM ~1 f32 tile smaller (re-reading bf16 from VMEM is cheap,
    # the kernel is HBM-bound).
    o_ref[...] = (x_ref[...].astype(jnp.float32) * inv * w_ref[...]).astype(o_ref.dtype)


def _vmem_config():
    """Generation-aware (live-tile budget, vmem_limit_bytes)."""
    try:
        cap = int(pltpu.get_tpu_info().vmem_capacity_bytes)
    except Exception:  # pragma: no cover - conservative fallback
        cap = 128 * 1024 * 1024
    if cap >= 128 * 1024 * 1024:
        # v5e / v6e: default scoped VMEM is small, so the explicit 48 MiB raise
        # is what enables large tiles; 48 MiB is safe against 128 MiB physical.
        return 32 * 1024 * 1024, 48 * 1024 * 1024
    # v7x: 64 MiB per TC -> keep headroom for double-buffering + Mosaic scratch.
    return 20 * 1024 * 1024, min(32 * 1024 * 1024, cap)


def _pick_tile_rows(rows, dim, dtype, budget):
    """Largest sublane-aligned row tile within the live-VMEM budget, with at
    least 2 (preferably 4+) grid steps so the parallel axis can megacore-shard."""
    itemsize = jnp.dtype(dtype).itemsize
    # Sublane pack factor: 8 rows for f32, 16 for bf16, 32 for int8/fp8.
    pack = 8 * max(1, 4 // itemsize)

    # Live bytes per tile row: double-buffered input + double-buffered output
    # (both in input dtype) + ~1 f32-wide temporary (the upcast/product, one at
    # a time thanks to the two-pass kernel).
    per_row = dim * (4 * itemsize + 4)
    # Reserve the resident (1, dim) f32 weight (x2 buffers) and a margin for
    # Mosaic internal scratch.
    reserved = 2 * dim * 4 + 4 * 1024 * 1024
    avail = max(budget - reserved, per_row * pack)

    tile = avail // max(per_row, 1)
    tile = max(pack, (tile // pack) * pack)
    # Let the budget decide for small dims; cap only to keep compile time sane.
    tile = min(tile, 4096)

    # Never larger than the (pack-aligned) number of rows actually present.
    rows_aligned = ((rows + pack - 1) // pack) * pack
    tile = min(tile, max(pack, rows_aligned))

    # Guarantee >= 2 grid steps (preferring >= 4) when there are enough rows,
    # so v7x's two TensorCores both get work on the "parallel" row axis.
    for min_steps in (4, 2):
        if rows >= min_steps * pack:
            cap = -(-rows // min_steps)              # ceil(rows / min_steps)
            cap = ((cap + pack - 1) // pack) * pack  # round up to pack
            tile = min(tile, max(pack, cap))
            break

    return int(tile)


def rmsnorm(x, weight, eps=1e-6, tile_rows=None):
    """x: (..., dim), weight: (dim,). Returns same shape/dtype as x."""
    orig_shape = x.shape
    dim = orig_shape[-1]
    rows = 1
    for s in orig_shape[:-1]:
        rows *= s
    x2 = x.reshape(rows, dim)

    budget, vmem_limit = _vmem_config()
    if tile_rows is None:
        tile_rows = _pick_tile_rows(rows, dim, x.dtype, budget)

    # Fast path wants a lane-aligned hidden dim (production Qwen dims are);
    # smaller dims still work via full-extent lane blocks (masked stores).
    # (No hard assert so tiny test shapes keep running.)

    # One-time tiny conversion; keeps the per-step kernel free of the weight cast.
    w2 = weight.astype(jnp.float32).reshape(1, dim)

    kernel = functools.partial(_rmsnorm_kernel, eps=float(eps))

    out = pl.pallas_call(
        kernel,
        out_shape=jax.ShapeDtypeStruct((rows, dim), x.dtype),
        grid_spec=pltpu.PrefetchScalarGridSpec(
            num_scalar_prefetch=0,
            grid=(pl.cdiv(rows, tile_rows),),
            in_specs=[
                pl.BlockSpec((tile_rows, dim), lambda i: (i, 0)),
                pl.BlockSpec((1, dim), lambda i: (0, 0)),
            ],
            out_specs=pl.BlockSpec((tile_rows, dim), lambda i: (i, 0)),
        ),
        compiler_params=pltpu.CompilerParams(
            dimension_semantics=("parallel",),
            vmem_limit_bytes=vmem_limit,
        ),
    )(x2, w2)

    return out.reshape(orig_shape)


def rmsnorm_reference(x, weight, eps=1e-6):
    xf = x.astype(jnp.float32)
    out = xf * jax.lax.rsqrt(jnp.mean(xf * xf, axis=-1, keepdims=True) + eps)
    return (out * weight.astype(jnp.float32)).astype(x.dtype)


if __name__ == "__main__":
    key = jax.random.PRNGKey(0)
    # Lane-aligned hidden dim (fast path), small shapes.
    batch, seq, hidden = 2, 8, 128
    x = jax.random.normal(key, (batch, seq, hidden), dtype=jnp.bfloat16)
    # Module initializes weight to ones; perturb deterministically so the scale matters.
    weight = jnp.ones((hidden,), dtype=jnp.float32) + 0.01 * jnp.arange(hidden, dtype=jnp.float32)

    y = rmsnorm(x, weight, eps=1e-6)
    y = jax.block_until_ready(y)

    y_ref = rmsnorm_reference(x, weight, eps=1e-6)
    assert y.shape == x.shape and y.dtype == x.dtype
    err = jnp.max(jnp.abs(y.astype(jnp.float32) - y_ref.astype(jnp.float32)))
    assert float(err) < 1e-2, f"max abs error {err}"

    # Ragged (rows % tile_rows != 0) case to cover the cdiv-grid path.
    x_ragged = jax.random.normal(jax.random.PRNGKey(1), (3, 7, hidden), dtype=jnp.bfloat16)
    y2 = jax.block_until_ready(rmsnorm(x_ragged, weight, eps=1e-6, tile_rows=16))
    y2_ref = rmsnorm_reference(x_ragged, weight, eps=1e-6)
    err2 = jnp.max(jnp.abs(y2.astype(jnp.float32) - y2_ref.astype(jnp.float32)))
    assert float(err2) < 1e-2, f"ragged max abs error {err2}"

    # Small, non-lane-aligned dim (handled path; masked stores, still correct).
    hidden_s = 32
    w_s = jnp.ones((hidden_s,), jnp.float32) + 0.01 * jnp.arange(hidden_s, dtype=jnp.float32)
    x_s = jax.random.normal(jax.random.PRNGKey(2), (2, 8, hidden_s), dtype=jnp.bfloat16)
    y3 = jax.block_until_ready(rmsnorm(x_s, w_s, eps=1e-6))
    y3_ref = rmsnorm_reference(x_s, w_s, eps=1e-6)
    err3 = jnp.max(jnp.abs(y3.astype(jnp.float32) - y3_ref.astype(jnp.float32)))
    assert float(err3) < 1e-2, f"small-dim max abs error {err3}"

    print("KERNEL_OK")
</pallas_src>

<mosaic_0001>
module attributes {stable_mosaic.version = 11 : i64} {
  func.func @_rmsnorm_kernel(%arg0: i32, %arg1: memref<16x128xbf16, #tpu.memory_space<vmem>>, %arg2: memref<1x128xf32, #tpu.memory_space<vmem>>, %arg3: memref<16x128xbf16, #tpu.memory_space<vmem>>) attributes {dimension_semantics = [#tpu.dimension_semantics<parallel>], iteration_bounds = array<i64: 1>, scalar_prefetch = 0 : i64, scratch_operands = 0 : i64, tpu.core_type = #tpu.core_type<tc>, window_params = [{transform_indices = @transform_0, window_bounds = array<i64: 16, 128>}, {pipeline_mode = #tpu.pipeline_mode<synchronous>, transform_indices = @transform_1, window_bounds = array<i64: 1, 128>}, {transform_indices = @transform_2, window_bounds = array<i64: 16, 128>}]} {
    %c0 = arith.constant 0 : index
    %c0_0 = arith.constant 0 : index
    %0 = vector.load %arg1[%c0, %c0_0] : memref<16x128xbf16, #tpu.memory_space<vmem>>, vector<16x128xbf16>
    %1 = arith.extf %0 : vector<16x128xbf16> to vector<16x128xf32>
    %2 = arith.mulf %1, %1 : vector<16x128xf32>
    %cst = arith.constant dense<0.000000e+00> : vector<16xf32>
    %3 = vector.multi_reduction <add>, %2, %cst [1] : vector<16x128xf32> to vector<16xf32>
    %4 = vector.shape_cast %3 : vector<16xf32> to vector<16x1xf32>
    %cst_1 = arith.constant 1.280000e+02 : f32
    %5 = vector.broadcast %cst_1 : f32 to vector<16x1xf32>
    %6 = arith.divf %4, %5 : vector<16x1xf32>
    %cst_2 = arith.constant 9.99999997E-7 : f32
    %7 = vector.broadcast %cst_2 : f32 to vector<16x1xf32>
    %8 = arith.addf %6, %7 : vector<16x1xf32>
    %9 = math.rsqrt %8 : vector<16x1xf32>
    %c0_3 = arith.constant 0 : index
    %c0_4 = arith.constant 0 : index
    %10 = vector.load %arg1[%c0_3, %c0_4] : memref<16x128xbf16, #tpu.memory_space<vmem>>, vector<16x128xbf16>
    %11 = arith.extf %10 : vector<16x128xbf16> to vector<16x128xf32>
    %12 = vector.broadcast %9 : vector<16x1xf32> to vector<16x128xf32>
    %13 = arith.mulf %11, %12 : vector<16x128xf32>
    %c0_5 = arith.constant 0 : index
    %c0_6 = arith.constant 0 : index
    %14 = vector.load %arg2[%c0_5, %c0_6] : memref<1x128xf32, #tpu.memory_space<vmem>>, vector<1x128xf32>
    %15 = vector.broadcast %14 : vector<1x128xf32> to vector<16x128xf32>
    %16 = arith.mulf %13, %15 : vector<16x128xf32>
    %17 = arith.truncf %16 : vector<16x128xf32> to vector<16x128xbf16>
    %c0_7 = arith.constant 0 : index
    %c0_8 = arith.constant 0 : index
    %18 = vector.load %arg3[%c0_7, %c0_8] : memref<16x128xbf16, #tpu.memory_space<vmem>>, vector<16x128xbf16>
    tpu.vector_store %arg3[%c0_7, %c0_8], %17 {strides = array<i32>} : memref<16x128xbf16, #tpu.memory_space<vmem>>, vector<16x128xbf16>,
    return
  }
  func.func @transform_0(%arg0: i32) -> (i32, i32) {
    %c0_i32 = arith.constant 0 : i32
    %c0_i32_0 = arith.constant 0 : i32
    return %arg0, %c0_i32 : i32, i32
  }
  func.func @transform_1(%arg0: i32) -> (i32, i32) {
    %c0_i32 = arith.constant 0 : i32
    %c0_i32_0 = arith.constant 0 : i32
    %c0_i32_1 = arith.constant 0 : i32
    return %c0_i32, %c0_i32_0 : i32, i32
  }
  func.func @transform_2(%arg0: i32) -> (i32, i32) {
    %c0_i32 = arith.constant 0 : i32
    %c0_i32_0 = arith.constant 0 : i32
    return %arg0, %c0_i32 : i32, i32
  }
}

</mosaic_0001>

<bundles_post_ra>
// kernel: tpu_custom_call.1
= control target key start
LH: loop header
LB: loop body
LE: loop exit
PB: predicated region body
PF: predicated region fallthrough
CT: control target
= control target key end

     0   :  { %7 = vsyncpa [#allocation3], 0  ;;  %s203_s0 = inlined_call_operand.hbm [shape: bf16[16,128], index: 0, kind: input, shape index: {}]   ;;  %s204_s1 = inlined_call_operand.vmem [shape: f32[1,128], index: 1, kind: input, shape index: {}]   ;;  %s205_s2 = inlined_call_operand.hbm [shape: bf16[16,128], index: 2, kind: output, shape index: {}]  }
   0x1   :  { %8 = vsyncpa [#allocation4], 0  ;;  %s151_s9 = smov [#allocation2]   ;;  %s103_s13 = scalar_lea.hbm %s203_s0, 128 }
   0x2   :  { %s14_s10 = sshll.u32 %s151_s9, 4  ;;  %p104_p0 = scmp.ne.s32.totalorder %s203_s0, %s103_s13  ;;  %s15_s10 = int_to_ptr.vmem [resolvable:$true] %s14_s10 }
   0x3   :  { %p107_p1 = scmp.lt.u32.totalorder %s103_s13, %s203_s0 }
   0x5   :  { %p109_p2 = pnand %p107_p1, %p104_p0 }
   0x7   :  { %112 = shalt.err (!%p109_p2)
}
   0x8   :  { %s113_s18 = scalar_lea.vmem %s15_s10, 128  ;;  %p118_p4 = scmp.lt.s32.totalorder %s15_s10, %s15_s10 }
   0x9   :  { %p114_p3 = scmp.ne.s32.totalorder %s15_s10, %s113_s18  ;;  %p119_p5 = scmp.lt.s32.totalorder %s113_s18, %s113_s18 }
   0xb   :  { %p120_p6 = por %p119_p5, %p118_p4 }
   0xd   :  { %p121_p7 = pnand %p120_p6, %p114_p3 }
   0xf   :  { %124 = shalt.err (!%p121_p7)
}
  0x10   :  { %s152_s19 = smov 64   ;;  %s153_s20 = smov 4  }
  0x11   :  { %20 = dma.hbm_to_vmem [thread:$0]  %s203_s0, 128, %s15_s10, [#allocation3], %s152_s19, %s152_s19, %s153_s20  }
  0x12   :  { %147 = dma.done.wait [#allocation3], 128  }
  0x13   :  { %148 = vsyncadd [#allocation3], 4294967168  ;;  %v87_v0 = vld [vmem:[#allocation2] sm:$0xff]   ;;  %s154_s24 = smov [#allocation5]  }
  0x14   :  { %v88_v1 = vunpack.c.l.bf16 %v87_v0  ;;  %v89_v2 = vunpack.c.h.bf16 %v87_v0  ;;  %v81_v14 = vld [vmem:[%s204_s1] ss:$0 sm:$0xff]  ;;  %s69_s25 = sshll.u32 %s154_s24, 4  ;;  %s70_s25 = int_to_ptr.vmem [resolvable:$true] %s69_s25 }
  0x15   :  { %s125_s26 = scalar_lea.vmem %s70_s25, 128  ;;  %p130_p9 = scmp.lt.s32.totalorder %s70_s25, %s70_s25 }
  0x16   :  { %v30_v3 = vmul.f32 %v88_v1, %v88_v1  ;;  %v31_v4 = vmul.f32 %v89_v2, %v89_v2  ;;  %p126_p8 = scmp.ne.s32.totalorder %s70_s25, %s125_s26  ;;  %p131_p10 = scmp.lt.s32.totalorder %s125_s26, %s125_s26 }
  0x18   :  { %32 = vadd.xlane.f32.xlu0 %v30_v3  ;;  %p132_p11 = por %p131_p10, %p130_p9 }
  0x1a   :  { %p133_p12 = pnand %p132_p11, %p126_p8 }
  0x1c   :  { %34 = vadd.xlane.f32.xlu0 %v31_v4 }
  0xa5   :  { %v33_v5 = vpop.xlane.xlu0 %32 }
  0xa6   :  { %v37_v6 = vmul.f32 0.0078125, %v33_v5 }
  0xa8   :  { %v39_v7 = vadd.f32 1e-06, %v37_v6 }
  0xa9   :  { %v35_v8 = vpop.xlane.xlu0 %34 }
  0xaa   :  { %99 = vrsqrt.f32 %v39_v7  ;;  %v38_v9 = vmul.f32 0.0078125, %v35_v8 }
  0xac   :  { %v40_v10 = vadd.f32 1e-06, %v38_v9 }
  0xae   :  { %101 = vrsqrt.f32 %v40_v10 }
  0xb4   :  { %v100_v11 = vpop.eup %99 }
  0xb5   :  { %v43_v12 = vmul.f32 %v100_v11, %v88_v1 }
  0xb7   :  { %v52_v16 = vmul.f32 %v81_v14, %v43_v12 }
  0xb8   :  { %v102_v13 = vpop.eup %101 }
  0xb9   :  { %v44_v15 = vmul.f32 %v102_v13, %v89_v2 }
  0xbb   :  { %v53_v17 = vmul.f32 %v81_v14, %v44_v15 }
  0xbd   :  { %v93_v18 = vpack.c.bf16 %v53_v17, %v52_v16 }
  0xbf   :  { %94 = vst [vmem:[#allocation5] sm:$0xff] %v93_v18  }
  0xc0   :  { %136 = shalt.err (!%p133_p12)
}
  0xc1   :  { %s137_s29 = scalar_lea.hbm %s205_s2, 128 }
  0xc2   :  { %p138_p13 = scmp.ne.s32.totalorder %s205_s2, %s137_s29  ;;  %p141_p0 = scmp.lt.u32.totalorder %s137_s29, %s205_s2 }
  0xc4   :  { %p143_p1 = pnand %p141_p0, %p138_p13 }
  0xc6   :  { %146 = shalt.err (!%p143_p1)
}
  0xc7   :  { %75 = dma.vmem_to_hbm [thread:$0]  %s70_s25, 128, %s205_s2, [#allocation4], %s152_s19, %s152_s19, %s153_s20  }
  0xc8   :  { %149 = dma.done.wait [#allocation4], 128  }
  0xc9   :  { %150 = vsyncadd [#allocation4], 4294967168 }
  0xca   :  { %79 = vsyncpa [#allocation3], 1 }
  0xcb   :  { %80 = vsyncpa [#allocation4], 1 }

</bundles_post_ra>
